<compile_context>
chip_gen: v5e
topology: v5e:2x2
jax: 0.10.0
libtpu: 0.0.40
codegen_flags: <defaults>
</compile_context>

<pallas_src>
import jax
import jax.numpy as jnp
from jax.experimental import pallas as pl
from jax.experimental.pallas import tpu as pltpu

_LANE = 128


def _round_up(n, m):
    return ((n + m - 1) // m) * m


def reward_kernel(x_ref, w1_ref, b1_ref, w2_ref, b2_ref, w3_ref, b3_ref, o_ref):
    # x_ref:  (bt, in)
    # w1_ref: (in, Hp)   b1_ref: (1, Hp)
    # w2_ref: (Hp, Hp)   b2_ref: (1, Hp)
    # w3_ref: (Hp, Op)   b3_ref: (1, Op)
    x = x_ref[...]

    # Layer 1: Linear + ReLU (f32 accumulation / elementwise).
    h = jnp.dot(x, w1_ref[...], preferred_element_type=jnp.float32) + b1_ref[...]
    h = jnp.maximum(h, 0.0)

    # Layer 2: Linear + ReLU.
    h = jnp.dot(h.astype(w2_ref.dtype), w2_ref[...],
                preferred_element_type=jnp.float32) + b2_ref[...]
    h = jnp.maximum(h, 0.0)

    # Reward head + sigmoid (EUP exp, f32).
    y = jnp.dot(h.astype(w3_ref.dtype), w3_ref[...],
                preferred_element_type=jnp.float32) + b3_ref[...]
    o_ref[...] = (1.0 / (1.0 + jnp.exp(-y))).astype(o_ref.dtype)


def reward_forward(x, w1, b1, w2, b2, w3, b3, *, bt=None, compute_dtype=None):
    """sigmoid(relu(relu(x@W1+b1)@W2+b2)@W3+b3), fused in one pallas_call."""
    B, in_features = x.shape
    hidden = w1.shape[1]
    out_features = w3.shape[1]

    # ---- pad feature dims to lane-dense (multiples of 128) widths --------------
    # Zero padding keeps the math exact through the ReLU layers; the padded sigmoid
    # columns are dropped by the wrapper slice below.
    hidden_p = _round_up(hidden, _LANE)
    out_p = _round_up(max(out_features, _LANE), _LANE)

    def pad2(a, rows, cols):
        a = a.reshape((-1, a.shape[-1])) if a.ndim == 2 else a.reshape(1, -1)
        return jnp.pad(a, ((0, rows - a.shape[0]), (0, cols - a.shape[1])))

    w1p = pad2(w1, in_features, hidden_p)
    b1p = pad2(b1, 1, hidden_p)
    w2p = pad2(w2, hidden_p, hidden_p)
    b2p = pad2(b2, 1, hidden_p)
    w3p = pad2(w3, hidden_p, out_p)
    b3p = pad2(b3, 1, out_p)

    # ---- optional narrow matmul operands (halves HBM traffic on v6e/v7x) -------
    if compute_dtype is not None:
        x = x.astype(compute_dtype)
        w1p = w1p.astype(compute_dtype)
        w2p = w2p.astype(compute_dtype)
        w3p = w3p.astype(compute_dtype)

    # ---- batch tiling: one big block for small B, 1024-row tiles otherwise -----
    if bt is None:
        bt = B if B <= 1024 else 1024
    Bp = _round_up(B, bt)
    if Bp != B:
        x = jnp.pad(x, ((0, Bp - B), (0, 0)))
    grid = (Bp // bt,)

    flops = 2 * Bp * (in_features * hidden_p + hidden_p * hidden_p + hidden_p * out_p)
    bytes_accessed = (
        x.size * x.dtype.itemsize
        + sum(int(a.size) * a.dtype.itemsize for a in (w1p, b1p, w2p, b2p, w3p, b3p))
        + Bp * out_p * 4
    )

    out = pl.pallas_call(
        reward_kernel,
        out_shape=jax.ShapeDtypeStruct((Bp, out_p), jnp.float32),
        grid_spec=pl.GridSpec(
            grid=grid,
            in_specs=[
                pl.BlockSpec((bt, in_features), lambda i: (i, 0)),        # x tile
                pl.BlockSpec((in_features, hidden_p), lambda i: (0, 0)),  # W1 (resident)
                pl.BlockSpec((1, hidden_p), lambda i: (0, 0)),            # b1
                pl.BlockSpec((hidden_p, hidden_p), lambda i: (0, 0)),     # W2 (resident)
                pl.BlockSpec((1, hidden_p), lambda i: (0, 0)),            # b2
                pl.BlockSpec((hidden_p, out_p), lambda i: (0, 0)),        # W3 (resident)
                pl.BlockSpec((1, out_p), lambda i: (0, 0)),               # b3
            ],
            out_specs=pl.BlockSpec((bt, out_p), lambda i: (i, 0)),
        ),
        compiler_params=pltpu.CompilerParams(
            dimension_semantics=("parallel",),
            vmem_limit_bytes=32 * 1024 * 1024,  # within v7x's 64 MiB physical budget
        ),
        cost_estimate=pl.CostEstimate(
            flops=flops,
            transcendentals=Bp * out_p,
            bytes_accessed=bytes_accessed,
        ),
    )(x, w1p, b1p, w2p, b2p, w3p, b3p)

    return out[:B, :out_features]


def init_params(key, input_size, hidden_size, out_size=1):
    """Deterministic init mimicking nn.Linear's uniform(-1/sqrt(fan_in), 1/sqrt(fan_in)).

    Weights are stored as [in, out] (transpose of PyTorch's [out, in]).
    """
    ks = jax.random.split(key, 6)

    def linear(kw, kb, fan_in, fan_out):
        bound = 1.0 / float(fan_in) ** 0.5
        w = jax.random.uniform(kw, (fan_in, fan_out), jnp.float32, -bound, bound)
        b = jax.random.uniform(kb, (fan_out,), jnp.float32, -bound, bound)
        return w, b

    w1, b1 = linear(ks[0], ks[1], input_size, hidden_size)
    w2, b2 = linear(ks[2], ks[3], hidden_size, hidden_size)
    w3, b3 = linear(ks[4], ks[5], hidden_size, out_size)
    return w1, b1, w2, b2, w3, b3


if __name__ == "__main__":
    state_size, action_size, latent_size = 16, 4, 12   # input_size = 32
    hidden_size = 100                                   # module default
    batch = 8
    input_size = state_size + action_size + latent_size

    key = jax.random.PRNGKey(0)
    kx, kp = jax.random.split(key)
    x = jax.random.normal(kx, (batch, input_size), jnp.float32)
    params = init_params(kp, input_size, hidden_size)
    w1, b1, w2, b2, w3, b3 = params

    # Fused kernel, f32 path (tiny batch -> single grid step).
    out = jax.block_until_ready(reward_forward(x, *params))

    # Plain-JAX reference (same math as the PyTorch module).
    h = jnp.maximum(x @ w1 + b1, 0.0)
    h = jnp.maximum(h @ w2 + b2, 0.0)
    ref = jax.nn.sigmoid(h @ w3 + b3)
    assert out.shape == (batch, 1)
    assert jnp.allclose(out, ref, atol=2e-4, rtol=2e-4), "f32 mismatch vs reference"

    # bf16 matmul-operand path (halves HBM traffic on v6e/v7x; f32 accumulation).
    out_bf16 = jax.block_until_ready(
        reward_forward(x, *params, compute_dtype=jnp.bfloat16))
    assert out_bf16.shape == (batch, 1)
    assert jnp.allclose(out_bf16, ref, atol=5e-2, rtol=5e-2), "bf16 mismatch vs reference"

    print("KERNEL_OK")
</pallas_src>

<mosaic_0001>
module attributes {stable_mosaic.version = 11 : i64} {
  func.func @reward_kernel(%arg0: i32, %arg1: memref<8x32xf32, #tpu.memory_space<vmem>>, %arg2: memref<32x128xf32, #tpu.memory_space<vmem>>, %arg3: memref<1x128xf32, #tpu.memory_space<vmem>>, %arg4: memref<128x128xf32, #tpu.memory_space<vmem>>, %arg5: memref<1x128xf32, #tpu.memory_space<vmem>>, %arg6: memref<128x128xf32, #tpu.memory_space<vmem>>, %arg7: memref<1x128xf32, #tpu.memory_space<vmem>>, %arg8: memref<8x128xf32, #tpu.memory_space<vmem>>) attributes {dimension_semantics = [#tpu.dimension_semantics<parallel>], iteration_bounds = array<i64: 1>, scalar_prefetch = 0 : i64, scratch_operands = 0 : i64, tpu.core_type = #tpu.core_type<tc>, window_params = [{transform_indices = @transform_0, window_bounds = array<i64: 8, 32>}, {pipeline_mode = #tpu.pipeline_mode<synchronous>, transform_indices = @transform_1, window_bounds = array<i64: 32, 128>}, {pipeline_mode = #tpu.pipeline_mode<synchronous>, transform_indices = @transform_2, window_bounds = array<i64: 1, 128>}, {pipeline_mode = #tpu.pipeline_mode<synchronous>, transform_indices = @transform_3, window_bounds = array<i64: 128, 128>}, {pipeline_mode = #tpu.pipeline_mode<synchronous>, transform_indices = @transform_4, window_bounds = array<i64: 1, 128>}, {pipeline_mode = #tpu.pipeline_mode<synchronous>, transform_indices = @transform_5, window_bounds = array<i64: 128, 128>}, {pipeline_mode = #tpu.pipeline_mode<synchronous>, transform_indices = @transform_6, window_bounds = array<i64: 1, 128>}, {transform_indices = @transform_7, window_bounds = array<i64: 8, 128>}]} {
    %c0 = arith.constant 0 : index
    %c0_0 = arith.constant 0 : index
    %0 = vector.load %arg1[%c0, %c0_0] : memref<8x32xf32, #tpu.memory_space<vmem>>, vector<8x32xf32>
    %c0_1 = arith.constant 0 : index
    %c0_2 = arith.constant 0 : index
    %1 = vector.load %arg2[%c0_1, %c0_2] : memref<32x128xf32, #tpu.memory_space<vmem>>, vector<32x128xf32>
    %cst = arith.constant dense<0.000000e+00> : vector<8x128xf32>
    %2 = tpu.matmul %0, %1, %cst {dimension_numbers = #tpu.dot_dimension_numbers<[1], [0], [0], [1], [0, 0, 1, 1], [], []>} : vector<8x32xf32>, vector<32x128xf32>, vector<8x128xf32> -> vector<8x128xf32>
    %c0_3 = arith.constant 0 : index
    %c0_4 = arith.constant 0 : index
    %3 = vector.load %arg3[%c0_3, %c0_4] : memref<1x128xf32, #tpu.memory_space<vmem>>, vector<1x128xf32>
    %4 = vector.broadcast %3 : vector<1x128xf32> to vector<8x128xf32>
    %5 = arith.addf %2, %4 : vector<8x128xf32>
    %cst_5 = arith.constant 0.000000e+00 : f32
    %6 = vector.broadcast %cst_5 : f32 to vector<8x128xf32>
    %7 = arith.maximumf %5, %6 : vector<8x128xf32>
    %c0_6 = arith.constant 0 : index
    %c0_7 = arith.constant 0 : index
    %8 = vector.load %arg4[%c0_6, %c0_7] : memref<128x128xf32, #tpu.memory_space<vmem>>, vector<128x128xf32>
    %cst_8 = arith.constant dense<0.000000e+00> : vector<8x128xf32>
    %9 = tpu.matmul %7, %8, %cst_8 {dimension_numbers = #tpu.dot_dimension_numbers<[1], [0], [0], [1], [0, 0, 1, 1], [], []>} : vector<8x128xf32>, vector<128x128xf32>, vector<8x128xf32> -> vector<8x128xf32>
    %c0_9 = arith.constant 0 : index
    %c0_10 = arith.constant 0 : index
    %10 = vector.load %arg5[%c0_9, %c0_10] : memref<1x128xf32, #tpu.memory_space<vmem>>, vector<1x128xf32>
    %11 = vector.broadcast %10 : vector<1x128xf32> to vector<8x128xf32>
    %12 = arith.addf %9, %11 : vector<8x128xf32>
    %cst_11 = arith.constant 0.000000e+00 : f32
    %13 = vector.broadcast %cst_11 : f32 to vector<8x128xf32>
    %14 = arith.maximumf %12, %13 : vector<8x128xf32>
    %c0_12 = arith.constant 0 : index
    %c0_13 = arith.constant 0 : index
    %15 = vector.load %arg6[%c0_12, %c0_13] : memref<128x128xf32, #tpu.memory_space<vmem>>, vector<128x128xf32>
    %cst_14 = arith.constant dense<0.000000e+00> : vector<8x128xf32>
    %16 = tpu.matmul %14, %15, %cst_14 {dimension_numbers = #tpu.dot_dimension_numbers<[1], [0], [0], [1], [0, 0, 1, 1], [], []>} : vector<8x128xf32>, vector<128x128xf32>, vector<8x128xf32> -> vector<8x128xf32>
    %c0_15 = arith.constant 0 : index
    %c0_16 = arith.constant 0 : index
    %17 = vector.load %arg7[%c0_15, %c0_16] : memref<1x128xf32, #tpu.memory_space<vmem>>, vector<1x128xf32>
    %18 = vector.broadcast %17 : vector<1x128xf32> to vector<8x128xf32>
    %19 = arith.addf %16, %18 : vector<8x128xf32>
    %cst_17 = arith.constant 0.000000e+00 : f32
    %20 = vector.broadcast %cst_17 : f32 to vector<8x128xf32>
    %21 = arith.subf %20, %19 : vector<8x128xf32>
    %22 = math.exp %21 : vector<8x128xf32>
    %cst_18 = arith.constant 1.000000e+00 : f32
    %23 = vector.broadcast %cst_18 : f32 to vector<8x128xf32>
    %24 = arith.addf %23, %22 : vector<8x128xf32>
    %cst_19 = arith.constant 1.000000e+00 : f32
    %25 = vector.broadcast %cst_19 : f32 to vector<8x128xf32>
    %26 = arith.divf %25, %24 : vector<8x128xf32>
    %c0_20 = arith.constant 0 : index
    %c0_21 = arith.constant 0 : index
    %27 = vector.load %arg8[%c0_20, %c0_21] : memref<8x128xf32, #tpu.memory_space<vmem>>, vector<8x128xf32>
    tpu.vector_store %arg8[%c0_20, %c0_21], %26 {strides = array<i32>} : memref<8x128xf32, #tpu.memory_space<vmem>>, vector<8x128xf32>,
    return
  }
  func.func @transform_0(%arg0: i32) -> (i32, i32) {
    %c0_i32 = arith.constant 0 : i32
    %c0_i32_0 = arith.constant 0 : i32
    return %arg0, %c0_i32 : i32, i32
  }
  func.func @transform_1(%arg0: i32) -> (i32, i32) {
    %c0_i32 = arith.constant 0 : i32
    %c0_i32_0 = arith.constant 0 : i32
    %c0_i32_1 = arith.constant 0 : i32
    return %c0_i32, %c0_i32_0 : i32, i32
  }
  func.func @transform_2(%arg0: i32) -> (i32, i32) {
    %c0_i32 = arith.constant 0 : i32
    %c0_i32_0 = arith.constant 0 : i32
    %c0_i32_1 = arith.constant 0 : i32
    return %c0_i32, %c0_i32_0 : i32, i32
  }
  func.func @transform_3(%arg0: i32) -> (i32, i32) {
    %c0_i32 = arith.constant 0 : i32
    %c0_i32_0 = arith.constant 0 : i32
    %c0_i32_1 = arith.constant 0 : i32
    return %c0_i32, %c0_i32_0 : i32, i32
  }
  func.func @transform_4(%arg0: i32) -> (i32, i32) {
    %c0_i32 = arith.constant 0 : i32
    %c0_i32_0 = arith.constant 0 : i32
    %c0_i32_1 = arith.constant 0 : i32
    return %c0_i32, %c0_i32_0 : i32, i32
  }
  func.func @transform_5(%arg0: i32) -> (i32, i32) {
    %c0_i32 = arith.constant 0 : i32
    %c0_i32_0 = arith.constant 0 : i32
    %c0_i32_1 = arith.constant 0 : i32
    return %c0_i32, %c0_i32_0 : i32, i32
  }
  func.func @transform_6(%arg0: i32) -> (i32, i32) {
    %c0_i32 = arith.constant 0 : i32
    %c0_i32_0 = arith.constant 0 : i32
    %c0_i32_1 = arith.constant 0 : i32
    return %c0_i32, %c0_i32_0 : i32, i32
  }
  func.func @transform_7(%arg0: i32) -> (i32, i32) {
    %c0_i32 = arith.constant 0 : i32
    %c0_i32_0 = arith.constant 0 : i32
    return %arg0, %c0_i32 : i32, i32
  }
}

</mosaic_0001>

<bundles_post_ra>
// kernel: tpu_custom_call.1
= control target key start
LH: loop header
LB: loop body
LE: loop exit
PB: predicated region body
PF: predicated region fallthrough
CT: control target
= control target key end

     0   :  { %12 = vsyncpa [#allocation3], 0  ;;  %s456_s0 = inlined_call_operand.hbm [shape: f32[8,32], index: 0, kind: input, shape index: {}]   ;;  %s457_s1 = inlined_call_operand.hbm [shape: f32[32,128], index: 1, kind: input, shape index: {}]   ;;  %s458_s2 = inlined_call_operand.vmem [shape: f32[1,128], index: 2, kind: input, shape index: {}]   ;;  %s459_s3 = inlined_call_operand.hbm [shape: f32[128,128], index: 3, kind: input, shape index: {}]   ;;  %s460_s4 = inlined_call_operand.vmem [shape: f32[1,128], index: 4, kind: input, shape index: {}]   ;;  %s461_s5 = inlined_call_operand.hbm [shape: f32[128,128], index: 5, kind: input, shape index: {}]   ;;  %s462_s6 = inlined_call_operand.vmem [shape: f32[1,128], index: 6, kind: input, shape index: {}]   ;;  %s463_s7 = inlined_call_operand.hbm [shape: f32[8,128], index: 7, kind: output, shape index: {}]  }
   0x1   :  { %13 = vsyncpa [#allocation6], 0 }
   0x2   :  { %14 = vsyncpa [#allocation9], 0  ;;  %s31_s26 = sshll.u32 %s457_s1, 4  ;;  %s32_s26 = int_to_ptr.hbm [resolvable:$true] %s31_s26 }
   0x3   :  { %15 = vsyncpa [#allocation4], 0  ;;  %s385_s27 = smov [#allocation5]   ;;  %s21_s8 = sshll.u32 %s456_s0, 4  ;;  %s22_s8 = int_to_ptr.hbm [resolvable:$true] %s21_s8 }
   0x4   :  { %s33_s28 = sshll.u32 %s385_s27, 4  ;;  %s386_s9 = smov 128   ;;  %s34_s28 = int_to_ptr.vmem [resolvable:$true] %s33_s28 }
   0x5   :  { %s387_s10 = smov 8   ;;  %s388_s11 = smov [#allocation2]  }
   0x6   :  { %39 = dma.hbm_to_vmem [thread:$0]  %s32_s26, 512, %s34_s28, [#allocation6], %s386_s9, %s386_s9, %s387_s10  }
   0x7   :  { %s23_s12 = sshll.u32 %s388_s11, 4  ;;  %s46_s15 = sshll.u32 %s459_s3, 4  ;;  %s24_s12 = int_to_ptr.vmem [resolvable:$true] %s23_s12  ;;  %s47_s15 = int_to_ptr.hbm [resolvable:$true] %s46_s15 }
   0x8   :  { %26 = dma.hbm_to_vmem [thread:$0]  %s22_s8, 128, %s24_s12, [#allocation3]  }
   0x9   :  { %s61_s17 = sshll.u32 %s461_s5, 4  ;;  %s389_s18 = smov [#allocation7]   ;;  %s62_s17 = int_to_ptr.hbm [resolvable:$true] %s61_s17 }
   0xa   :  { %s48_s19 = sshll.u32 %s389_s18, 4  ;;  %s390_s0 = smov [#allocation8]   ;;  %s49_s19 = int_to_ptr.vmem [resolvable:$true] %s48_s19 }
   0xb   :  { %54 = dma.hbm_to_vmem [thread:$0]  %s47_s15, 2048, %s49_s19, [#allocation6], %s386_s9, %s386_s9, %s387_s10  }
   0xc   :  { %s63_s20 = sshll.u32 %s390_s0, 4  ;;  %s64_s20 = int_to_ptr.vmem [resolvable:$true] %s63_s20 }
   0xd   :  { %69 = dma.hbm_to_vmem [thread:$0]  %s62_s17, 2048, %s64_s20, [#allocation9], %s386_s9, %s386_s9, %s387_s10  }
   0xe   :  { %377 = dma.done.wait [#allocation3], 128  }
   0xf   :  { %378 = vsyncadd [#allocation3], 4294967168 }
  0x10   :  { %379 = dma.done.wait [#allocation6], 2560  }
  0x11   :  { %380 = vsyncadd [#allocation6], 4294964736 }
  0x12   :  { %381 = dma.done.wait [#allocation9], 2048  }
  0x13   :  { %382 = vsyncadd [#allocation9], 4294965248  ;;  %v92_v0 = vld [vmem:[#allocation5 + $0x18] sm:$0xff]  ;;  %v91_v1 = vld [vmem:[#allocation5 + $0x10] sm:$0xff]  ;;  %vm97_vm0 = vcmask 261120  }
  0x14   :  { %113 = vmatpush.msra.mxu0 %v92_v0  ;;  %v137_v2 = vld [vmem:[#allocation7 + $0x78] sm:$0xff]  ;;  %v90_v3 = vld [vmem:[#allocation5 + $0x8] sm:$0xff]  ;;  %v136_v4 = vld [vmem:[#allocation7 + $0x70] sm:$0xff] }
  0x15   :  { %142 = vmatpush.msra.mxu1 %v137_v2  ;;  %v135_v5 = vld [vmem:[#allocation7 + $0x68] sm:$0xff]  ;;  %v89_v6 = vld [vmem:[#allocation5] sm:$0xff]  ;;  %v88_v7 = vld [vmem:[#allocation2] sm:$0xff] }
  0x16   :  { %114 = vmatpush.msra.mxu0 %v91_v1  ;;  %v134_v8 = vld [vmem:[#allocation7 + $0x60] sm:$0xff]  ;;  %v133_v9 = vld [vmem:[#allocation7 + $0x58] sm:$0xff]  ;;  %v132_v10 = vld [vmem:[#allocation7 + $0x50] sm:$0xff] }
  0x17   :  { %143 = vmatpush.msra.mxu1 %v136_v4  ;;  %v131_v11 = vld [vmem:[#allocation7 + $0x48] sm:$0xff]  ;;  %v130_v12 = vld [vmem:[#allocation7 + $0x40] sm:$0xff]  ;;  %v129_v13 = vld [vmem:[#allocation7 + $0x38] sm:$0xff] }
  0x18   :  { %115 = vmatpush.msra.mxu0 %v90_v3  ;;  %v128_v14 = vld [vmem:[#allocation7 + $0x30] sm:$0xff]  ;;  %v127_v15 = vld [vmem:[#allocation7 + $0x28] sm:$0xff]  ;;  %v126_v16 = vld [vmem:[#allocation7 + $0x20] sm:$0xff] }
  0x19   :  { %144 = vmatpush.msra.mxu1 %v135_v5  ;;  %v125_v17 = vld [vmem:[#allocation7 + $0x18] sm:$0xff]  ;;  %v124_v18 = vld [vmem:[#allocation7 + $0x10] sm:$0xff]  ;;  %v123_v19 = vld [vmem:[#allocation7 + $0x8] sm:$0xff] }
  0x1a   :  { %116 = vmatpush.msra.mxu0 %v89_v6  ;;  %v122_v20 = vld [vmem:[#allocation7] sm:$0xff]  ;;  %v178_v21 = vld [vmem:[#allocation8 + $0x78] sm:$0xff]  ;;  %v177_v22 = vld [vmem:[#allocation8 + $0x70] sm:$0xff] }
  0x1b   :  { %242 = vmatmul.msk.f32.vlgmr.msra.gmra.mxu0 %vm97_vm0, %v88_v7  ;;  %145 = vmatpush.msra.mxu1 %v134_v8  ;;  %v176_v23 = vld [vmem:[#allocation8 + $0x68] sm:$0xff]  ;;  %v175_v24 = vld [vmem:[#allocation8 + $0x60] sm:$0xff]  ;;  %v174_v25 = vld [vmem:[#allocation8 + $0x58] sm:$0xff] }
  0x1c   :  { %183 = vmatpush.msra.mxu2 %v178_v21  ;;  %v173_v26 = vld [vmem:[#allocation8 + $0x50] sm:$0xff]  ;;  %v172_v27 = vld [vmem:[#allocation8 + $0x48] sm:$0xff]  ;;  %v171_v28 = vld [vmem:[#allocation8 + $0x40] sm:$0xff] }
  0x1d   :  { %146 = vmatpush.msra.mxu1 %v133_v9  ;;  %v170_v29 = vld [vmem:[#allocation8 + $0x38] sm:$0xff]  ;;  %v169_v30 = vld [vmem:[#allocation8 + $0x30] sm:$0xff]  ;;  %v168_v31 = vld [vmem:[#allocation8 + $0x28] sm:$0xff] }
  0x1e   :  { %184 = vmatpush.msra.mxu2 %v177_v22  ;;  %v167_v32 = vld [vmem:[#allocation8 + $0x20] sm:$0xff]  ;;  %v166_v33 = vld [vmem:[#allocation8 + $0x18] sm:$0xff]  ;;  %v165_v38 = vld [vmem:[#allocation8 + $0x10] sm:$0xff] }
  0x1f   :  { %147 = vmatpush.msra.mxu1 %v132_v10  ;;  %v250_v34 = vld [vmem:[%s458_s2] ss:$0 sm:$0xff]  ;;  %v164_v39 = vld [vmem:[#allocation8 + $0x8] sm:$0xff]  ;;  %v163_v40 = vld [vmem:[#allocation8] sm:$0xff] }
  0x20   :  { %185 = vmatpush.msra.mxu2 %v176_v23  ;;  %v251_v41 = vld [vmem:[%s460_s4] ss:$0 sm:$0xff]  ;;  %s391_s4 = smov [#allocation10]  }
  0x21   :  { %148 = vmatpush.msra.mxu1 %v131_v11  ;;  %v252_v45 = vld [vmem:[%s462_s6] ss:$0 sm:$0xff]  ;;  %s228_s24 = sshll.u32 %s391_s4, 4  ;;  %s230_s6 = sshll.u32 %s463_s7, 4  ;;  %s229_s24 = int_to_ptr.vmem [resolvable:$true] %s228_s24  ;;  %s231_s6 = int_to_ptr.hbm [resolvable:$true] %s230_s6 }
  0x22   :  { %186 = vmatpush.msra.mxu2 %v175_v24 }
  0x23   :  { %149 = vmatpush.msra.mxu1 %v130_v12 }
  0x24   :  { %187 = vmatpush.msra.mxu2 %v174_v25 }
  0x25   :  { %150 = vmatpush.msra.mxu1 %v129_v13 }
  0x26   :  { %188 = vmatpush.msra.mxu2 %v173_v26 }
  0x27   :  { %151 = vmatpush.msra.mxu1 %v128_v14 }
  0x28   :  { %189 = vmatpush.msra.mxu2 %v172_v27 }
  0x29   :  { %152 = vmatpush.msra.mxu1 %v127_v15 }
  0x2a   :  { %190 = vmatpush.msra.mxu2 %v171_v28 }
  0x2b   :  { %153 = vmatpush.msra.mxu1 %v126_v16 }
  0x2c   :  { %191 = vmatpush.msra.mxu2 %v170_v29 }
  0x2d   :  { %154 = vmatpush.msra.mxu1 %v125_v17 }
  0x2e   :  { %192 = vmatpush.msra.mxu2 %v169_v30 }
  0x2f   :  { %155 = vmatpush.msra.mxu1 %v124_v18 }
  0x30   :  { %193 = vmatpush.msra.mxu2 %v168_v31 }
  0x31   :  { %156 = vmatpush.msra.mxu1 %v123_v19 }
  0x32   :  { %194 = vmatpush.msra.mxu2 %v167_v32 }
  0x33   :  { %157 = vmatpush.msra.mxu1 %v122_v20 }
  0x34   :  { %195 = vmatpush.msra.mxu2 %v166_v33 }
  0x36   :  { %196 = vmatpush.msra.mxu2 %v165_v38 }
  0x38   :  { %197 = vmatpush.msra.mxu2 %v164_v39 }
  0x3a   :  { %198 = vmatpush.msra.mxu2 %v163_v40 }
  0x98   :  { %v118_v35 = vpop.f32.mrf.mxu0 }
  0x99   :  { %v119_v36 = vadd.f32 %v250_v34, %v118_v35 }
  0x9b   :  { %v121_v37 = vmax.f32 %v119_v36, 0.0 }
  0x9d   :  { %158 = vmatmul.f32.vlgmr.msra.gmra.mxu1 %v121_v37 }
 0x11a   :  { %v159_v42 = vpop.f32.mrf.mxu1 }
 0x11b   :  { %v160_v43 = vadd.f32 %v251_v41, %v159_v42 }
 0x11d   :  { %v162_v44 = vmax.f32 %v160_v43, 0.0 }
 0x11f   :  { %199 = vmatmul.f32.vlgmr.msra.gmra.mxu2 %v162_v44 }
 0x1a2   :  { %v200_v46 = vpop.f32.mrf.mxu2 }
 0x1a3   :  { %v201_v47 = vadd.f32 %v252_v45, %v200_v46 }
 0x1a5   :  { %v203_v48 = vsub.f32 0.0, %v201_v47 }
 0x1a7   :  { %v204_v49 = vmul.f32 1.442695, %v203_v48 }
 0x1a9   :  { %253 = vpow2.f32 %v204_v49 }
 0x1af   :  { %v254_v50 = vpop.eup %253 }
 0x1b0   :  { %v206_v51 = vadd.f32 1.0, %v254_v50 }
 0x1b2   :  { %255 = vrcp.f32 %v206_v51  ;;  %v218_v55 = vand.u32 2147483648, %v206_v51  ;;  %v216_v57 = vand.u32 2147483647, %v206_v51  ;;  %vm212_vm2 = vweird.f32 %v206_v51 }
 0x1b4   :  { %v219_v59 = vor.u32 1.1754944e-38, %v218_v55  ;;  %vm217_vm4 = vcmp.eq.f32.partialorder %v216_v57, 8.507059e+37 }
 0x1b8   :  { %v256_v52 = vpop.eup %255 }
 0x1b9   :  { %v208_v53 = vmul.f32 %v256_v52, %v206_v51  ;;  %vm213_vm1 = vweird.f32 %v256_v52 }
 0x1ba   :  { %vm214_vm3 = vmor %vm212_vm2, %vm213_vm1 }
 0x1bb   :  { %v209_v54 = vsub.f32 1.0, %v208_v53 }
 0x1bd   :  { %v210_v56 = vmul.f32 %v256_v52, %v209_v54 }
 0x1bf   :  { %v211_v58 = vadd.f32 %v256_v52, %v210_v56 }
 0x1c1   :  { %v215_v60 = vsel %vm214_vm3, %v256_v52, %v211_v58 }
 0x1c2   :  { %v220_v61 = vsel %vm217_vm4, %v219_v59, %v215_v60 }
 0x1c3   :  { %222 = vst [vmem:[#allocation10] sm:$0xff] %v220_v61 }
 0x1c4   :  { %233 = dma.vmem_to_hbm [thread:$0]  %s229_s24, 128, %s231_s6, [#allocation4]  }
 0x1c5   :  { %383 = dma.done.wait [#allocation4], 128  }
 0x1c6   :  { %384 = vsyncadd [#allocation4], 4294967168 }
 0x1c7   :  { %238 = vsyncpa [#allocation3], 1 }
 0x1c8   :  { %239 = vsyncpa [#allocation6], 1 }
 0x1c9   :  { %240 = vsyncpa [#allocation9], 1 }
 0x1ca   :  { %241 = vsyncpa [#allocation4], 1 }

</bundles_post_ra>
